<compile_context>
chip_gen: v5e
topology: v5e:2x2
jax: 0.10.0
libtpu: 0.0.40
codegen_flags: <defaults>
</compile_context>

<pallas_src>
import jax
import jax.numpy as jnp
from jax.experimental import pallas as pl
from jax.experimental.pallas import tpu as pltpu

_EPS = 1e-5
_VMEM_LIMIT_BYTES = 32 * 1024 * 1024


# --------------------------------------------------------------- kernels
def _shifted_cat(h):
    """(L, C) -> (L, 3C) with columns [h[l-1] | h[l] | h[l+1]], zero-padded ends.

    Shifts along L use pltpu.roll (XLU, essentially free next to MXU/VPU work)
    plus an iota mask instead of concatenate/reshape copies of the activation.
    """
    l = h.shape[0]
    row = jax.lax.broadcasted_iota(jnp.int32, h.shape, 0)
    h_prev = jnp.where(row == 0, 0.0, pltpu.roll(h, 1, 0))          # h[l-1]
    h_next = jnp.where(row == l - 1, 0.0, pltpu.roll(h, l - 1, 0))  # h[l+1]
    return jnp.concatenate([h_prev, h, h_next], axis=-1)


def _conv1_kernel(x_ref, w_ref, h_ref, st_ref):
    """conv1 (k=3, pad=1, no bias) for one sample + BN1 partial (sum, sum_sq)."""
    x = x_ref[0]                                            # (L, C) f32
    cat = _shifted_cat(x).astype(jnp.bfloat16)              # bf16 MXU operand
    h = jnp.dot(cat, w_ref[...], preferred_element_type=jnp.float32)  # (L, P) f32
    h_ref[0] = h
    st_ref[0] = jnp.concatenate(
        [jnp.sum(h, axis=0, keepdims=True),
         jnp.sum(h * h, axis=0, keepdims=True)], axis=0)    # (2, P)


def _conv2_kernel(h1_ref, sc_ref, sh_ref, w_ref, h_ref, st_ref):
    """Folded BN1 (scale/shift) + relu + conv2 + BN2 partial (sum, sum_sq)."""
    h = jnp.maximum(h1_ref[0] * sc_ref[...] + sh_ref[...], 0.0)   # (L, P) f32
    cat = _shifted_cat(h).astype(jnp.bfloat16)
    h2 = jnp.dot(cat, w_ref[...], preferred_element_type=jnp.float32)
    h_ref[0] = h2
    st_ref[0] = jnp.concatenate(
        [jnp.sum(h2, axis=0, keepdims=True),
         jnp.sum(h2 * h2, axis=0, keepdims=True)], axis=0)


def _finalize_kernel(h2_ref, sc_ref, sh_ref, x_ref, y_ref):
    """Folded BN2 + residual add + relu."""
    out = h2_ref[0] * sc_ref[...] + sh_ref[...] + x_ref[0]
    y_ref[0] = jnp.maximum(out, 0.0).astype(y_ref.dtype)


# --------------------------------------------------------------- wrapper
def _full_spec(shape):
    """Whole-array block, revisited every grid step (loaded once, stays in VMEM)."""
    nd = len(shape)
    return pl.BlockSpec(shape, lambda n: (0,) * nd)


def _sample_spec(shape):
    """One sample (leading-axis slice) per grid step."""
    nd = len(shape)
    return pl.BlockSpec((1,) + tuple(shape[1:]), lambda n: (n,) + (0,) * (nd - 1))


def _fold_bn(partials, gamma, beta, count):
    """Per-sample (sum, sum_sq) partials -> per-channel BN scale/shift (f32)."""
    s = jnp.sum(partials[:, 0, :], axis=0)
    ss = jnp.sum(partials[:, 1, :], axis=0)
    mean = s / count
    var = ss / count - mean * mean      # biased variance, f32 accumulation
    inv = jax.lax.rsqrt(var + _EPS)
    scale = gamma * inv
    shift = beta - mean * scale
    return scale.reshape(1, -1), shift.reshape(1, -1)


def _stack_conv_weight(w):
    """torch Conv1d weight (out, in, 3) -> tap-major (3*in, out) bf16 matrix."""
    out_c, in_c, k = w.shape
    return jnp.transpose(w, (2, 1, 0)).reshape(k * in_c, out_c).astype(jnp.bfloat16)


@jax.jit
def basic_block_forward(x_nlc, params):
    """BasicBlock forward.  x_nlc: (N, L, C) float32, channels-last (the PyTorch
    NCL tensor transposed once at model I/O; kept NLC end-to-end)."""
    n, l, c = x_nlc.shape
    p = params['w1'].shape[0]
    # expansion == 1, stride == 1, downsample is None  =>  planes == inplanes.
    assert p == c, "residual add needs planes == inplanes (downsample=None)"

    w1s = _stack_conv_weight(params['w1'])      # (3c, p) bf16
    w2s = _stack_conv_weight(params['w2'])      # (3p, p) bf16

    cp = pltpu.CompilerParams(dimension_semantics=("parallel",),
                              vmem_limit_bytes=_VMEM_LIMIT_BYTES)
    act_bytes = 4 * n * l * c
    w_bytes = 2 * 3 * c * p
    st_bytes = 4 * n * 2 * p
    conv_flops = 2 * n * l * (3 * c) * p

    # ---- pass 1: conv1 + BN1 partial statistics --------------------------
    h1, st1 = pl.pallas_call(
        _conv1_kernel,
        grid=(n,),
        in_specs=[_sample_spec((n, l, c)), _full_spec((3 * c, p))],
        out_specs=(_sample_spec((n, l, p)), _sample_spec((n, 2, p))),
        out_shape=(jax.ShapeDtypeStruct((n, l, p), jnp.float32),
                   jax.ShapeDtypeStruct((n, 2, p), jnp.float32)),
        compiler_params=cp,
        cost_estimate=pl.CostEstimate(
            flops=conv_flops, transcendentals=0,
            bytes_accessed=2 * act_bytes + w_bytes + st_bytes),
    )(x_nlc, w1s)
    scale1, shift1 = _fold_bn(st1, params['g1'], params['be1'], n * l)

    # ---- pass 2: folded BN1 + relu + conv2 + BN2 partial statistics ------
    h2, st2 = pl.pallas_call(
        _conv2_kernel,
        grid=(n,),
        in_specs=[_sample_spec((n, l, p)), _full_spec((1, p)), _full_spec((1, p)),
                  _full_spec((3 * p, p))],
        out_specs=(_sample_spec((n, l, p)), _sample_spec((n, 2, p))),
        out_shape=(jax.ShapeDtypeStruct((n, l, p), jnp.float32),
                   jax.ShapeDtypeStruct((n, 2, p), jnp.float32)),
        compiler_params=cp,
        cost_estimate=pl.CostEstimate(
            flops=2 * n * l * (3 * p) * p + 4 * n * l * p, transcendentals=0,
            bytes_accessed=2 * act_bytes + w_bytes + st_bytes),
    )(h1, scale1, shift1, w2s)
    scale2, shift2 = _fold_bn(st2, params['g2'], params['be2'], n * l)

    # ---- pass 3: folded BN2 + residual + relu -----------------------------
    y = pl.pallas_call(
        _finalize_kernel,
        grid=(n,),
        in_specs=[_sample_spec((n, l, p)), _full_spec((1, p)), _full_spec((1, p)),
                  _sample_spec((n, l, c))],
        out_specs=_sample_spec((n, l, c)),
        out_shape=jax.ShapeDtypeStruct((n, l, c), jnp.float32),
        compiler_params=cp,
        cost_estimate=pl.CostEstimate(
            flops=4 * n * l * c, transcendentals=0, bytes_accessed=3 * act_bytes),
    )(h2, scale2, shift2, x_nlc)
    return y


# --------------------------------------------------------------- reference
def _torch_ref(x_nlc, prm):
    """Pure-JAX f32 reference reproducing the PyTorch forward exactly
    (Conv1d with bias=True, training-mode BatchNorm1d), NLC in/out."""
    x = jnp.transpose(x_nlc, (0, 2, 1))                              # NCL

    def conv1d(inp, w, b):
        out = jax.lax.conv_general_dilated(
            inp, w, window_strides=(1,), padding=[(1, 1)],
            dimension_numbers=('NCH', 'OIH', 'NCH'))
        return out + b[None, :, None]

    def bn(inp, g, be):
        mean = inp.mean(axis=(0, 2), keepdims=True)
        var = ((inp - mean) ** 2).mean(axis=(0, 2), keepdims=True)
        return (inp - mean) / jnp.sqrt(var + _EPS) * g[None, :, None] + be[None, :, None]

    out = jax.nn.relu(bn(conv1d(x, prm['w1'], prm['b1']), prm['g1'], prm['be1']))
    out = bn(conv1d(out, prm['w2'], prm['b2']), prm['g2'], prm['be2'])
    out = jax.nn.relu(out + x)
    return jnp.transpose(out, (0, 2, 1))                             # back to NLC


if __name__ == "__main__":
    # Small but lane-aligned config: channels a multiple of 128 (full lane
    # vectors, unmasked vst) and L a multiple of 8 (clean sublane tiles).
    n, l = 4, 32
    inplanes = planes = 128     # BasicBlock.expansion == 1, downsample=None

    key = jax.random.PRNGKey(0)
    ks = jax.random.split(key, 10)

    def rnd(k, shape, s=0.1):
        return s * jax.random.normal(k, shape, jnp.float32)

    params = {
        'w1':  rnd(ks[0], (planes, inplanes, 3)),
        'b1':  rnd(ks[1], (planes,)),
        'g1':  1.0 + rnd(ks[2], (planes,)),
        'be1': rnd(ks[3], (planes,)),
        'w2':  rnd(ks[4], (planes, planes, 3)),
        'b2':  rnd(ks[5], (planes,)),
        'g2':  1.0 + rnd(ks[6], (planes,)),
        'be2': rnd(ks[7], (planes,)),
    }
    x_nlc = jax.random.normal(ks[9], (n, l, inplanes), jnp.float32)

    out = jax.block_until_ready(basic_block_forward(x_nlc, params))
    ref = _torch_ref(x_nlc, params)

    assert out.shape == (n, l, inplanes), out.shape
    max_err = float(jnp.max(jnp.abs(out - ref)))
    mean_err = float(jnp.mean(jnp.abs(out - ref)))
    # bf16 MXU operands vs an all-f32 reference -> ~1e-2-level differences.
    assert max_err < 1e-1 and mean_err < 1e-2, (max_err, mean_err)
    print("KERNEL_OK")
</pallas_src>

<mosaic_0001>
module attributes {stable_mosaic.version = 11 : i64} {
  func.func @_conv1_kernel(%arg0: i32, %arg1: memref<1x32x128xf32, #tpu.memory_space<vmem>>, %arg2: memref<384x128xbf16, #tpu.memory_space<vmem>>, %arg3: memref<1x32x128xf32, #tpu.memory_space<vmem>>, %arg4: memref<1x2x128xf32, #tpu.memory_space<vmem>>) attributes {dimension_semantics = [#tpu.dimension_semantics<parallel>], iteration_bounds = array<i64: 4>, scalar_prefetch = 0 : i64, scratch_operands = 0 : i64, tpu.core_type = #tpu.core_type<tc>, window_params = [{transform_indices = @transform_0, window_bounds = array<i64: 1, 32, 128>}, {pipeline_mode = #tpu.pipeline_mode<synchronous>, transform_indices = @transform_1, window_bounds = array<i64: 384, 128>}, {transform_indices = @transform_2, window_bounds = array<i64: 1, 32, 128>}, {transform_indices = @transform_3, window_bounds = array<i64: 1, 2, 128>}]} {
    %c0 = arith.constant 0 : index
    %c0_0 = arith.constant 0 : index
    %c0_1 = arith.constant 0 : index
    %0 = vector.load %arg1[%c0, %c0_0, %c0_1] : memref<1x32x128xf32, #tpu.memory_space<vmem>>, vector<1x32x128xf32>
    %1 = vector.shape_cast %0 : vector<1x32x128xf32> to vector<32x128xf32>
    %2 = tpu.iota {dimensions = array<i32: 0>} : vector<32x128xi32>
    %c0_i32 = arith.constant 0 : i32
    %3 = vector.broadcast %c0_i32 : i32 to vector<32x128xi32>
    %4 = arith.cmpi eq, %2, %3 : vector<32x128xi32>
    %c1_i32 = arith.constant 1 : i32
    %5 = tpu.dynamic_rotate %1 by %c1_i32 dim 0 : vector<32x128xf32>, i32 -> vector<32x128xf32>
    %cst = arith.constant 0.000000e+00 : f32
    %6 = vector.broadcast %cst : f32 to vector<32x128xf32>
    %7 = arith.select %4, %6, %5 : vector<32x128xi1>, vector<32x128xf32>
    %c31_i32 = arith.constant 31 : i32
    %8 = vector.broadcast %c31_i32 : i32 to vector<32x128xi32>
    %9 = arith.cmpi eq, %2, %8 : vector<32x128xi32>
    %c31_i32_2 = arith.constant 31 : i32
    %10 = tpu.dynamic_rotate %1 by %c31_i32_2 dim 0 : vector<32x128xf32>, i32 -> vector<32x128xf32>
    %cst_3 = arith.constant 0.000000e+00 : f32
    %11 = vector.broadcast %cst_3 : f32 to vector<32x128xf32>
    %12 = arith.select %9, %11, %10 : vector<32x128xi1>, vector<32x128xf32>
    %13 = tpu.concatenate %7, %1, %12 in 1 : vector<32x128xf32>, vector<32x128xf32>, vector<32x128xf32> -> vector<32x384xf32>
    %14 = arith.truncf %13 : vector<32x384xf32> to vector<32x384xbf16>
    %c0_4 = arith.constant 0 : index
    %c0_5 = arith.constant 0 : index
    %15 = vector.load %arg2[%c0_4, %c0_5] : memref<384x128xbf16, #tpu.memory_space<vmem>>, vector<384x128xbf16>
    %cst_6 = arith.constant dense<0.000000e+00> : vector<32x128xf32>
    %16 = tpu.matmul %14, %15, %cst_6 {dimension_numbers = #tpu.dot_dimension_numbers<[1], [0], [0], [1], [0, 0, 1, 1], [], []>} : vector<32x384xbf16>, vector<384x128xbf16>, vector<32x128xf32> -> vector<32x128xf32>
    %c0_7 = arith.constant 0 : index
    %c0_8 = arith.constant 0 : index
    %c0_9 = arith.constant 0 : index
    %17 = vector.load %arg3[%c0_7, %c0_8, %c0_9] : memref<1x32x128xf32, #tpu.memory_space<vmem>>, vector<1x32x128xf32>
    %18 = vector.shape_cast %17 : vector<1x32x128xf32> to vector<32x128xf32>
    %19 = vector.shape_cast %16 : vector<32x128xf32> to vector<1x32x128xf32>
    tpu.vector_store %arg3[%c0_7, %c0_8, %c0_9], %19 {strides = array<i32>} : memref<1x32x128xf32, #tpu.memory_space<vmem>>, vector<1x32x128xf32>,
    %cst_10 = arith.constant dense<0.000000e+00> : vector<128xf32>
    %20 = vector.multi_reduction <add>, %16, %cst_10 [0] : vector<32x128xf32> to vector<128xf32>
    %21 = vector.shape_cast %20 : vector<128xf32> to vector<1x128xf32>
    %22 = arith.mulf %16, %16 : vector<32x128xf32>
    %cst_11 = arith.constant dense<0.000000e+00> : vector<128xf32>
    %23 = vector.multi_reduction <add>, %22, %cst_11 [0] : vector<32x128xf32> to vector<128xf32>
    %24 = vector.shape_cast %23 : vector<128xf32> to vector<1x128xf32>
    %25 = tpu.concatenate %21, %24 in 0 : vector<1x128xf32>, vector<1x128xf32> -> vector<2x128xf32>
    %c0_12 = arith.constant 0 : index
    %c0_13 = arith.constant 0 : index
    %c0_14 = arith.constant 0 : index
    %26 = vector.load %arg4[%c0_12, %c0_13, %c0_14] : memref<1x2x128xf32, #tpu.memory_space<vmem>>, vector<1x2x128xf32>
    %27 = vector.shape_cast %26 : vector<1x2x128xf32> to vector<2x128xf32>
    %28 = vector.shape_cast %25 : vector<2x128xf32> to vector<1x2x128xf32>
    tpu.vector_store %arg4[%c0_12, %c0_13, %c0_14], %28 {strides = array<i32>} : memref<1x2x128xf32, #tpu.memory_space<vmem>>, vector<1x2x128xf32>,
    return
  }
  func.func @transform_0(%arg0: i32) -> (i32, i32, i32) {
    %c0_i32 = arith.constant 0 : i32
    %c0_i32_0 = arith.constant 0 : i32
    %c0_i32_1 = arith.constant 0 : i32
    return %arg0, %c0_i32, %c0_i32_0 : i32, i32, i32
  }
  func.func @transform_1(%arg0: i32) -> (i32, i32) {
    %c0_i32 = arith.constant 0 : i32
    %c0_i32_0 = arith.constant 0 : i32
    %c0_i32_1 = arith.constant 0 : i32
    return %c0_i32, %c0_i32_0 : i32, i32
  }
  func.func @transform_2(%arg0: i32) -> (i32, i32, i32) {
    %c0_i32 = arith.constant 0 : i32
    %c0_i32_0 = arith.constant 0 : i32
    %c0_i32_1 = arith.constant 0 : i32
    return %arg0, %c0_i32, %c0_i32_0 : i32, i32, i32
  }
  func.func @transform_3(%arg0: i32) -> (i32, i32, i32) {
    %c0_i32 = arith.constant 0 : i32
    %c0_i32_0 = arith.constant 0 : i32
    %c0_i32_1 = arith.constant 0 : i32
    return %arg0, %c0_i32, %c0_i32_0 : i32, i32, i32
  }
}

module attributes {stable_mosaic.version = 11 : i64} {
  func.func @_finalize_kernel(%arg0: i32, %arg1: memref<1x32x128xf32, #tpu.memory_space<vmem>>, %arg2: memref<1x128xf32, #tpu.memory_space<vmem>>, %arg3: memref<1x128xf32, #tpu.memory_space<vmem>>, %arg4: memref<1x32x128xf32, #tpu.memory_space<vmem>>, %arg5: memref<1x32x128xf32, #tpu.memory_space<vmem>>) attributes {dimension_semantics = [#tpu.dimension_semantics<parallel>], iteration_bounds = array<i64: 4>, scalar_prefetch = 0 : i64, scratch_operands = 0 : i64, tpu.core_type = #tpu.core_type<tc>, window_params = [{transform_indices = @transform_0, window_bounds = array<i64: 1, 32, 128>}, {pipeline_mode = #tpu.pipeline_mode<synchronous>, transform_indices = @transform_1, window_bounds = array<i64: 1, 128>}, {pipeline_mode = #tpu.pipeline_mode<synchronous>, transform_indices = @transform_2, window_bounds = array<i64: 1, 128>}, {transform_indices = @transform_3, window_bounds = array<i64: 1, 32, 128>}, {transform_indices = @transform_4, window_bounds = array<i64: 1, 32, 128>}]} {
    %c0 = arith.constant 0 : index
    %c0_0 = arith.constant 0 : index
    %c0_1 = arith.constant 0 : index
    %0 = vector.load %arg1[%c0, %c0_0, %c0_1] : memref<1x32x128xf32, #tpu.memory_space<vmem>>, vector<1x32x128xf32>
    %1 = vector.shape_cast %0 : vector<1x32x128xf32> to vector<32x128xf32>
    %c0_2 = arith.constant 0 : index
    %c0_3 = arith.constant 0 : index
    %2 = vector.load %arg2[%c0_2, %c0_3] : memref<1x128xf32, #tpu.memory_space<vmem>>, vector<1x128xf32>
    %3 = vector.broadcast %2 : vector<1x128xf32> to vector<32x128xf32>
    %4 = arith.mulf %1, %3 : vector<32x128xf32>
    %c0_4 = arith.constant 0 : index
    %c0_5 = arith.constant 0 : index
    %5 = vector.load %arg3[%c0_4, %c0_5] : memref<1x128xf32, #tpu.memory_space<vmem>>, vector<1x128xf32>
    %6 = vector.broadcast %5 : vector<1x128xf32> to vector<32x128xf32>
    %7 = arith.addf %4, %6 : vector<32x128xf32>
    %c0_6 = arith.constant 0 : index
    %c0_7 = arith.constant 0 : index
    %c0_8 = arith.constant 0 : index
    %8 = vector.load %arg4[%c0_6, %c0_7, %c0_8] : memref<1x32x128xf32, #tpu.memory_space<vmem>>, vector<1x32x128xf32>
    %9 = vector.shape_cast %8 : vector<1x32x128xf32> to vector<32x128xf32>
    %10 = arith.addf %7, %9 : vector<32x128xf32>
    %cst = arith.constant 0.000000e+00 : f32
    %11 = vector.broadcast %cst : f32 to vector<32x128xf32>
    %12 = arith.maximumf %10, %11 : vector<32x128xf32>
    %c0_9 = arith.constant 0 : index
    %c0_10 = arith.constant 0 : index
    %c0_11 = arith.constant 0 : index
    %13 = vector.load %arg5[%c0_9, %c0_10, %c0_11] : memref<1x32x128xf32, #tpu.memory_space<vmem>>, vector<1x32x128xf32>
    %14 = vector.shape_cast %13 : vector<1x32x128xf32> to vector<32x128xf32>
    %15 = vector.shape_cast %12 : vector<32x128xf32> to vector<1x32x128xf32>
    tpu.vector_store %arg5[%c0_9, %c0_10, %c0_11], %15 {strides = array<i32>} : memref<1x32x128xf32, #tpu.memory_space<vmem>>, vector<1x32x128xf32>,
    return
  }
  func.func @transform_0(%arg0: i32) -> (i32, i32, i32) {
    %c0_i32 = arith.constant 0 : i32
    %c0_i32_0 = arith.constant 0 : i32
    %c0_i32_1 = arith.constant 0 : i32
    return %arg0, %c0_i32, %c0_i32_0 : i32, i32, i32
  }
  func.func @transform_1(%arg0: i32) -> (i32, i32) {
    %c0_i32 = arith.constant 0 : i32
    %c0_i32_0 = arith.constant 0 : i32
    %c0_i32_1 = arith.constant 0 : i32
    return %c0_i32, %c0_i32_0 : i32, i32
  }
  func.func @transform_2(%arg0: i32) -> (i32, i32) {
    %c0_i32 = arith.constant 0 : i32
    %c0_i32_0 = arith.constant 0 : i32
    %c0_i32_1 = arith.constant 0 : i32
    return %c0_i32, %c0_i32_0 : i32, i32
  }
  func.func @transform_3(%arg0: i32) -> (i32, i32, i32) {
    %c0_i32 = arith.constant 0 : i32
    %c0_i32_0 = arith.constant 0 : i32
    %c0_i32_1 = arith.constant 0 : i32
    return %arg0, %c0_i32, %c0_i32_0 : i32, i32, i32
  }
  func.func @transform_4(%arg0: i32) -> (i32, i32, i32) {
    %c0_i32 = arith.constant 0 : i32
    %c0_i32_0 = arith.constant 0 : i32
    %c0_i32_1 = arith.constant 0 : i32
    return %arg0, %c0_i32, %c0_i32_0 : i32, i32, i32
  }
}

module attributes {stable_mosaic.version = 11 : i64} {
  func.func @_conv2_kernel(%arg0: i32, %arg1: memref<1x32x128xf32, #tpu.memory_space<vmem>>, %arg2: memref<1x128xf32, #tpu.memory_space<vmem>>, %arg3: memref<1x128xf32, #tpu.memory_space<vmem>>, %arg4: memref<384x128xbf16, #tpu.memory_space<vmem>>, %arg5: memref<1x32x128xf32, #tpu.memory_space<vmem>>, %arg6: memref<1x2x128xf32, #tpu.memory_space<vmem>>) attributes {dimension_semantics = [#tpu.dimension_semantics<parallel>], iteration_bounds = array<i64: 4>, scalar_prefetch = 0 : i64, scratch_operands = 0 : i64, tpu.core_type = #tpu.core_type<tc>, window_params = [{transform_indices = @transform_0, window_bounds = array<i64: 1, 32, 128>}, {pipeline_mode = #tpu.pipeline_mode<synchronous>, transform_indices = @transform_1, window_bounds = array<i64: 1, 128>}, {pipeline_mode = #tpu.pipeline_mode<synchronous>, transform_indices = @transform_2, window_bounds = array<i64: 1, 128>}, {pipeline_mode = #tpu.pipeline_mode<synchronous>, transform_indices = @transform_3, window_bounds = array<i64: 384, 128>}, {transform_indices = @transform_4, window_bounds = array<i64: 1, 32, 128>}, {transform_indices = @transform_5, window_bounds = array<i64: 1, 2, 128>}]} {
    %c0 = arith.constant 0 : index
    %c0_0 = arith.constant 0 : index
    %c0_1 = arith.constant 0 : index
    %0 = vector.load %arg1[%c0, %c0_0, %c0_1] : memref<1x32x128xf32, #tpu.memory_space<vmem>>, vector<1x32x128xf32>
    %1 = vector.shape_cast %0 : vector<1x32x128xf32> to vector<32x128xf32>
    %c0_2 = arith.constant 0 : index
    %c0_3 = arith.constant 0 : index
    %2 = vector.load %arg2[%c0_2, %c0_3] : memref<1x128xf32, #tpu.memory_space<vmem>>, vector<1x128xf32>
    %3 = vector.broadcast %2 : vector<1x128xf32> to vector<32x128xf32>
    %4 = arith.mulf %1, %3 : vector<32x128xf32>
    %c0_4 = arith.constant 0 : index
    %c0_5 = arith.constant 0 : index
    %5 = vector.load %arg3[%c0_4, %c0_5] : memref<1x128xf32, #tpu.memory_space<vmem>>, vector<1x128xf32>
    %6 = vector.broadcast %5 : vector<1x128xf32> to vector<32x128xf32>
    %7 = arith.addf %4, %6 : vector<32x128xf32>
    %cst = arith.constant 0.000000e+00 : f32
    %8 = vector.broadcast %cst : f32 to vector<32x128xf32>
    %9 = arith.maximumf %7, %8 : vector<32x128xf32>
    %10 = tpu.iota {dimensions = array<i32: 0>} : vector<32x128xi32>
    %c0_i32 = arith.constant 0 : i32
    %11 = vector.broadcast %c0_i32 : i32 to vector<32x128xi32>
    %12 = arith.cmpi eq, %10, %11 : vector<32x128xi32>
    %c1_i32 = arith.constant 1 : i32
    %13 = tpu.dynamic_rotate %9 by %c1_i32 dim 0 : vector<32x128xf32>, i32 -> vector<32x128xf32>
    %cst_6 = arith.constant 0.000000e+00 : f32
    %14 = vector.broadcast %cst_6 : f32 to vector<32x128xf32>
    %15 = arith.select %12, %14, %13 : vector<32x128xi1>, vector<32x128xf32>
    %c31_i32 = arith.constant 31 : i32
    %16 = vector.broadcast %c31_i32 : i32 to vector<32x128xi32>
    %17 = arith.cmpi eq, %10, %16 : vector<32x128xi32>
    %c31_i32_7 = arith.constant 31 : i32
    %18 = tpu.dynamic_rotate %9 by %c31_i32_7 dim 0 : vector<32x128xf32>, i32 -> vector<32x128xf32>
    %cst_8 = arith.constant 0.000000e+00 : f32
    %19 = vector.broadcast %cst_8 : f32 to vector<32x128xf32>
    %20 = arith.select %17, %19, %18 : vector<32x128xi1>, vector<32x128xf32>
    %21 = tpu.concatenate %15, %9, %20 in 1 : vector<32x128xf32>, vector<32x128xf32>, vector<32x128xf32> -> vector<32x384xf32>
    %22 = arith.truncf %21 : vector<32x384xf32> to vector<32x384xbf16>
    %c0_9 = arith.constant 0 : index
    %c0_10 = arith.constant 0 : index
    %23 = vector.load %arg4[%c0_9, %c0_10] : memref<384x128xbf16, #tpu.memory_space<vmem>>, vector<384x128xbf16>
    %cst_11 = arith.constant dense<0.000000e+00> : vector<32x128xf32>
    %24 = tpu.matmul %22, %23, %cst_11 {dimension_numbers = #tpu.dot_dimension_numbers<[1], [0], [0], [1], [0, 0, 1, 1], [], []>} : vector<32x384xbf16>, vector<384x128xbf16>, vector<32x128xf32> -> vector<32x128xf32>
    %c0_12 = arith.constant 0 : index
    %c0_13 = arith.constant 0 : index
    %c0_14 = arith.constant 0 : index
    %25 = vector.load %arg5[%c0_12, %c0_13, %c0_14] : memref<1x32x128xf32, #tpu.memory_space<vmem>>, vector<1x32x128xf32>
    %26 = vector.shape_cast %25 : vector<1x32x128xf32> to vector<32x128xf32>
    %27 = vector.shape_cast %24 : vector<32x128xf32> to vector<1x32x128xf32>
    tpu.vector_store %arg5[%c0_12, %c0_13, %c0_14], %27 {strides = array<i32>} : memref<1x32x128xf32, #tpu.memory_space<vmem>>, vector<1x32x128xf32>,
    %cst_15 = arith.constant dense<0.000000e+00> : vector<128xf32>
    %28 = vector.multi_reduction <add>, %24, %cst_15 [0] : vector<32x128xf32> to vector<128xf32>
    %29 = vector.shape_cast %28 : vector<128xf32> to vector<1x128xf32>
    %30 = arith.mulf %24, %24 : vector<32x128xf32>
    %cst_16 = arith.constant dense<0.000000e+00> : vector<128xf32>
    %31 = vector.multi_reduction <add>, %30, %cst_16 [0] : vector<32x128xf32> to vector<128xf32>
    %32 = vector.shape_cast %31 : vector<128xf32> to vector<1x128xf32>
    %33 = tpu.concatenate %29, %32 in 0 : vector<1x128xf32>, vector<1x128xf32> -> vector<2x128xf32>
    %c0_17 = arith.constant 0 : index
    %c0_18 = arith.constant 0 : index
    %c0_19 = arith.constant 0 : index
    %34 = vector.load %arg6[%c0_17, %c0_18, %c0_19] : memref<1x2x128xf32, #tpu.memory_space<vmem>>, vector<1x2x128xf32>
    %35 = vector.shape_cast %34 : vector<1x2x128xf32> to vector<2x128xf32>
    %36 = vector.shape_cast %33 : vector<2x128xf32> to vector<1x2x128xf32>
    tpu.vector_store %arg6[%c0_17, %c0_18, %c0_19], %36 {strides = array<i32>} : memref<1x2x128xf32, #tpu.memory_space<vmem>>, vector<1x2x128xf32>,
    return
  }
  func.func @transform_0(%arg0: i32) -> (i32, i32, i32) {
    %c0_i32 = arith.constant 0 : i32
    %c0_i32_0 = arith.constant 0 : i32
    %c0_i32_1 = arith.constant 0 : i32
    return %arg0, %c0_i32, %c0_i32_0 : i32, i32, i32
  }
  func.func @transform_1(%arg0: i32) -> (i32, i32) {
    %c0_i32 = arith.constant 0 : i32
    %c0_i32_0 = arith.constant 0 : i32
    %c0_i32_1 = arith.constant 0 : i32
    return %c0_i32, %c0_i32_0 : i32, i32
  }
  func.func @transform_2(%arg0: i32) -> (i32, i32) {
    %c0_i32 = arith.constant 0 : i32
    %c0_i32_0 = arith.constant 0 : i32
    %c0_i32_1 = arith.constant 0 : i32
    return %c0_i32, %c0_i32_0 : i32, i32
  }
  func.func @transform_3(%arg0: i32) -> (i32, i32) {
    %c0_i32 = arith.constant 0 : i32
    %c0_i32_0 = arith.constant 0 : i32
    %c0_i32_1 = arith.constant 0 : i32
    return %c0_i32, %c0_i32_0 : i32, i32
  }
  func.func @transform_4(%arg0: i32) -> (i32, i32, i32) {
    %c0_i32 = arith.constant 0 : i32
    %c0_i32_0 = arith.constant 0 : i32
    %c0_i32_1 = arith.constant 0 : i32
    return %arg0, %c0_i32, %c0_i32_0 : i32, i32, i32
  }
  func.func @transform_5(%arg0: i32) -> (i32, i32, i32) {
    %c0_i32 = arith.constant 0 : i32
    %c0_i32_0 = arith.constant 0 : i32
    %c0_i32_1 = arith.constant 0 : i32
    return %arg0, %c0_i32, %c0_i32_0 : i32, i32, i32
  }
}

</mosaic_0001>

<bundles_post_ra>
// kernel: basic_block_forward.5
= control target key start
LH: loop header
LB: loop body
LE: loop exit
PB: predicated region body
PF: predicated region fallthrough
CT: control target
= control target key end

     0   :  { %9 = vsyncpa [#allocation3], 0  ;;  %s591_s0 = inlined_call_operand.vmem [shape: f32[4,32,128], index: 0, kind: input, shape index: {}]   ;;  %s592_s1 = inlined_call_operand.vmem [shape: f32[1,128], index: 1, kind: input, shape index: {}]   ;;  %s593_s2 = inlined_call_operand.vmem [shape: f32[1,128], index: 2, kind: input, shape index: {}]   ;;  %s594_s3 = inlined_call_operand.vmem [shape: f32[4,32,128], index: 3, kind: input, shape index: {}]   ;;  %s595_s4 = inlined_call_operand.hbm [shape: f32[4,32,128], index: 4, kind: output, shape index: {}]  }
   0x1   :  { %11 = vsyncpa [#allocation3 + $0x1], 0  ;;  %s493_s15 = smov 0   ;;  %s495_s16 = smov 0  }
   0x2   :  { %s497_s17 = smov 0   ;;  %s499_s18 = smov 0  }
   0x3 LB: > { %s514_s19 = sadd.s32 4294967295, %s464_s18   ;;  %s342_s20 = sadd.s32 4294967294, %s464_s18   ;;  %s464_s18 = sphi %s499_s18, %s601_s18   ;;  %s460_s17 = sphi %s497_s17, %s600_s17   ;;  %s456_s16 = sphi %s495_s16, %s599_s16   ;;  %s452_s15 = sphi %s493_s15, %s598_s15  }
   0x4   : > { %s518_s21 = sadd.s32 1, %s464_s18   ;;  %s118_s22 = sadd.s32 1, %s460_s17 }
   0x5   : > { %s115_s23 = ssub.s32 %s464_s18, %s518_s21  ;;  %p128_p0 = scmp.ne.s32.totalorder %s460_s17, %s456_s16 }
   0x6   : > { %p116_p1 = scmp.eq.s32.totalorder %s115_s23, 0  ;;  %p129_p2 = scmp.eq.s32.totalorder %s514_s19, 3 }
   0x7   : > { %p134_p3 = scmp.ne.s32.totalorder %s456_s16, %s452_s15  ;;  %p135_p4 = scmp.eq.s32.totalorder %s342_s20, 3 }
   0x8   : > { %s529_s24 = scalar_select %p116_p1, %s460_s17, %s118_s22  }
   0x9   : > { %p531_p5 = por %p129_p2, %p128_p0  ;;  %p535_p6 = por %p135_p4, %p134_p3 }
   0xa   : > { %p345_p7 = scmp.ge.s32.totalorder %s464_s18, 1  ;;  %p175_p8 = scmp.lt.s32.totalorder %s464_s18, 5 }
   0xc   : > { %p176_p9 = pnand %p345_p7, %p175_p8 }
   0xd   : > { %p206_p10 = scmp.lt.s32.totalorder (!%p176_p9), %s514_s19, 3  ;;  %s203_s28 = sand.u32 (!%p176_p9), 1, %s456_s16  }
   0xe   : > { %179 = sbr.rel (%p176_p9) target bundleno = 39 (0x27), region = 36  ;;  %s346_s14 = sshll.u32 (!%p176_p9), %s203_s28, 5 }
   0xf   : > { %s358_s20 = sshll.u32 (!%p176_p9), %s514_s19, 5  ;;  %s205_s29 = scalar_lea.vmem (!%p176_p9), [#allocation2], %s346_s14 }
  0x10   : > { %s422_s10 = scalar_lea.hbm (!%p176_p9), %s595_s4, 128 }
  0x13   : > { %s207_s27 = scalar_select %p206_p10, %s514_s19, 3  ;;  %v400_v0 = vld [vmem:[%s592_s1] ss:$0 sm:$0xff] }
  0x14   : > { %v401_v1 = vld [vmem:[%s593_s2] ss:$0 sm:$0xff]  ;;  %s265_s19 = sshll.u32 %s205_s29, 4  ;;  %s266_s19 = int_to_ptr.vmem [resolvable:$true] %s265_s19 }
  0x15   : > { %s356_s5 = sshll.u32 %s207_s27, 5  ;;  %s264_s27 = scalar_lea.hbm %s595_s4, %s358_s20 }
  0x16   : > { %s210_s8 = scalar_lea.vmem %s591_s0, %s356_s5  ;;  %s215_s11 = scalar_lea.vmem %s594_s3, %s356_s5 }
  0x17   : > { %v216_v2 = vld [vmem:[%s210_s8] sm:$0xff]  ;;  %v217_v3 = vld [vmem:[%s210_s8 + $0x8] sm:$0xff]  ;;  %v218_v6 = vld [vmem:[%s210_s8 + $0x10] sm:$0xff]  ;;  %s267_s30 = sshll.u32 %s264_s27, 4  ;;  %s253_s5 = scalar_lea.sflag [#allocation3], %s203_s28  ;;  %s268_s30 = int_to_ptr.hbm [resolvable:$true] %s267_s30 }
  0x18   : > { %v224_v4 = vmul.f32 %v400_v0, %v216_v2  ;;  %v225_v5 = vmul.f32 %v400_v0, %v217_v3  ;;  %v236_v7 = vld [vmem:[%s215_s11] sm:$0xff]  ;;  %v237_v8 = vld [vmem:[%s215_s11 + $0x8] sm:$0xff]  ;;  %v226_v9 = vmul.f32 %v400_v0, %v218_v6  ;;  %v219_v10 = vld [vmem:[%s210_s8 + $0x18] sm:$0xff]  ;;  %s416_s6 = sshra.s32 %s268_s30, 4  ;;  %s417_s6 = int_to_ptr.hbm [resolvable:$true] %s416_s6 }
  0x19   : > { %v238_v13 = vld [vmem:[%s215_s11 + $0x10] sm:$0xff]  ;;  %v227_v14 = vmul.f32 %v400_v0, %v219_v10  ;;  %v239_v16 = vld [vmem:[%s215_s11 + $0x18] sm:$0xff]  ;;  %s418_s7 = scalar_lea.hbm %s417_s6, 32  ;;  %p423_p0 = scmp.lt.s32.totalorder %s417_s6, %s595_s4 }
  0x1a   : > { %v232_v11 = vadd.f32 %v401_v1, %v224_v4  ;;  %v233_v12 = vadd.f32 %v401_v1, %v225_v5  ;;  %v234_v15 = vadd.f32 %v401_v1, %v226_v9  ;;  %p419_p11 = scmp.ne.s32.totalorder %s417_s6, %s418_s7  ;;  %p424_p1 = scmp.lt.s32.totalorder %s422_s10, %s418_s7 }
  0x1b   : > { %v235_v19 = vadd.f32 %v401_v1, %v227_v14 }
  0x1c   : > { %v240_v17 = vadd.f32 %v236_v7, %v232_v11  ;;  %v241_v18 = vadd.f32 %v237_v8, %v233_v12  ;;  %v242_v20 = vadd.f32 %v238_v13, %v234_v15  ;;  %p420_p12 = pnand %p419_p11, %p531_p5  ;;  %p425_p2 = por %p424_p1, %p423_p0 }
  0x1d   : > { %v243_v23 = vadd.f32 %v239_v16, %v235_v19 }
  0x1e   : > { %v244_v21 = vmax.f32 %v240_v17, 0.0  ;;  %v245_v22 = vmax.f32 %v241_v18, 0.0  ;;  %v246_v24 = vmax.f32 %v242_v20, 0.0  ;;  %p421_p13 = pneg %p420_p12 }
  0x1f   : > { %v247_v25 = vmax.f32 %v243_v23, 0.0 }
  0x20   : > { %248 = vst [vmem:[%s205_s29] sm:$0xff] %v244_v21  ;;  %p426_p3 = pnand %p425_p2, %p421_p13 }
  0x21   : > { %249 = vst [vmem:[%s205_s29 + $0x8] sm:$0xff] %v245_v22 }
  0x22   : > { %250 = vst [vmem:[%s205_s29 + $0x10] sm:$0xff] %v246_v24 }
  0x23   : > { %251 = vst [vmem:[%s205_s29 + $0x18] sm:$0xff] %v247_v25 }
  0x24   : > { %429 = shalt.err (!%p426_p3)
}
  0x25   : > { %s466_s28 = smov 128   ;;  %s467_s13 = smov 8  }
  0x26   : > { %359 = dma.vmem_to_hbm [thread:$0]  (%p531_p5), %s266_s19, 512, %s268_s30, %s253_s5, %s466_s28, %s466_s28, %s467_s13  }
  0x27 PF: > { %p365_p4 = scmp.ge.s32.totalorder %s464_s18, 2  ;;  %s282_s14 = sand.u32 1, %s452_s15  }
  0x28   : > { %s283_s20 = scalar_lea.sflag [#allocation3], %s282_s14 }
  0x29   : > { %p362_p7 = pnand %p365_p4, %p535_p6 }
  0x2b   : > { %p363_p8 = pneg %p362_p7 }
  0x2d   : > { %447 = dma.done.wait (%p363_p8), %s283_s20, 512  }
  0x2e   : > { %449 = vsyncadd (%p363_p8), %s283_s20, 4294966784  ;;  %p14_p9 = scmp.ge.s32.totalorder %s518_s21, 6   ;;  %s598_s15 = smov %s456_s16 }
  0x2f   : > { %s599_s16 = smov %s460_s17  ;;  %s600_s17 = smov %s529_s24 }
  0x30   : > { %s601_s18 = smov %s518_s21  ;;  %16 = sbr.rel (!%p14_p9) target bundleno = 3 (0x3), region = 74 }
  0x35   :  { %289 = vsyncpa [#allocation3], 1 }
  0x36   :  { %291 = vsyncpa [#allocation3 + $0x1], 1 }

// kernel: basic_block_forward.3
= control target key start
LH: loop header
LB: loop body
LE: loop exit
PB: predicated region body
PF: predicated region fallthrough
CT: control target
= control target key end

     0   :  { %s785_s12 = smov 0   ;;  %s895_s0 = inlined_call_operand.vmem [shape: f32[4,32,128], index: 0, kind: input, shape index: {}]   ;;  %s896_s1 = inlined_call_operand.vmem [shape: bf16[384,128], index: 1, kind: input, shape index: {}]   ;;  %s897_s2 = inlined_call_operand.vmem [shape: f32[4,32,128], index: 2, kind: output, shape index: {0}]   ;;  %s898_s3 = inlined_call_operand.vmem [shape: f32[4,2,128], index: 3, kind: output, shape index: {1}]  }
   0x1 LB: > { %s595_s13 = sadd.s32 4294967295, %s762_s12   ;;  %p599_p0 = scmp.ge.s32.totalorder %s762_s12, 1  ;;  %s762_s12 = sphi %s785_s12, %s14_s12  }
   0x2   : > { %p140_p1 = scmp.lt.s32.totalorder %s762_s12, 5 }
   0x4   : > { %p141_p2 = pnand %p599_p0, %p140_p1 }
   0x5   : > { %p168_p3 = scmp.lt.s32.totalorder (!%p141_p2), %s595_s13, 3 }
   0x6   : > { %144 = sbr.rel (%p141_p2) target bundleno = 221 (0xdd), region = 28 }
   0xb   : > { %v720_v0 = vld [vmem:[%s896_s1 + $0x38] sm:$0xff]  ;;  %v719_v3 = vld [vmem:[%s896_s1 + $0x30] sm:$0xff]  ;;  %v718_v6 = vld [vmem:[%s896_s1 + $0x28] sm:$0xff]  ;;  %s900_s13 = smov (!%p168_p3, %s595_s13), 3  ;;  %v186_v15 = vlaneseq  ;;  %vm764_vm3 = vmmov 1   ;;  %vm506_vm7 = vcmask 1040384  }
   0xc   : > { %v728_v1 = vld [vmem:[%s896_s1 + $0x78] sm:$0xff]  ;;  %423 = vmatpush.bf16.msra.mxu0 %v720_v0  ;;  %v727_v4 = vld [vmem:[%s896_s1 + $0x70] sm:$0xff]  ;;  %739 = vmatpush.bf16.msra.mxu3 %v720_v0  ;;  %v726_v7 = vld [vmem:[%s896_s1 + $0x68] sm:$0xff]  ;;  %s711_s11 = sshll.u32 %s900_s13, 5 }
   0xd   : > { %v736_v2 = vld [vmem:[%s896_s1 + $0xb8] sm:$0xff]  ;;  %442 = vmatpush.bf16.msra.mxu1 %v728_v1  ;;  %v735_v5 = vld [vmem:[%s896_s1 + $0xb0] sm:$0xff]  ;;  %v734_v8 = vld [vmem:[%s896_s1 + $0xa8] sm:$0xff]  ;;  %s172_s22 = scalar_lea.vmem %s895_s0, %s711_s11  ;;  %v187_v22 = vshrl.u32 %v186_v15, 7  ;;  %s177_s19 = scalar_lea.vmem %s897_s2, %s711_s11 }
   0xe   : > { %461 = vmatpush.bf16.msra.mxu2 %v736_v2  ;;  %v717_v9 = vld [vmem:[%s896_s1 + $0x20] sm:$0xff]  ;;  %v716_v12 = vld [vmem:[%s896_s1 + $0x18] sm:$0xff]  ;;  %v715_v16 = vld [vmem:[%s896_s1 + $0x10] sm:$0xff]  ;;  %s604_s11 = sshll.u32 %s900_s13, 1 }
   0xf   : > { %v725_v10 = vld [vmem:[%s896_s1 + $0x60] sm:$0xff]  ;;  %v724_v13 = vld [vmem:[%s896_s1 + $0x58] sm:$0xff]  ;;  %v723_v17 = vld [vmem:[%s896_s1 + $0x50] sm:$0xff]  ;;  %vm199_vm0 = vcmp.lt.s32.totalorder %v187_v22, 1  ;;  %vm216_vm1 = vcmp.lt.s32.totalorder %v187_v22, 7  ;;  %vm737_vm2 = vcmp.ne.s32.totalorder %v187_v22, 0 }
  0x10   : > { %424 = vmatpush.bf16.msra.mxu0 %v719_v3  ;;  %740 = vmatpush.bf16.msra.mxu3 %v719_v3  ;;  %v733_v11 = vld [vmem:[%s896_s1 + $0xa0] sm:$0xff]  ;;  %v732_v14 = vld [vmem:[%s896_s1 + $0x98] sm:$0xff]  ;;  %v731_v18 = vld [vmem:[%s896_s1 + $0x90] sm:$0xff]  ;;  %v190_v48 = vadd.s32 24, %v187_v22 }
  0x11   : > { %443 = vmatpush.bf16.msra.mxu1 %v727_v4  ;;  %v182_v19 = vld [vmem:[%s172_s22] sm:$0xff]  ;;  %v183_v20 = vld [vmem:[%s172_s22 + $0x8] sm:$0xff]  ;;  %v185_v21 = vld [vmem:[%s172_s22 + $0x18] sm:$0xff] }
  0x12   : > { %462 = vmatpush.bf16.msra.mxu2 %v735_v5  ;;  %v184_v23 = vld [vmem:[%s172_s22 + $0x10] sm:$0xff]  ;;  %v195_v24 = vrot.slane %v182_v19, 7  ;;  %v714_v25 = vld [vmem:[%s896_s1 + $0x8] sm:$0xff]  ;;  %v196_v27 = vrot.slane %v183_v20, 7  ;;  %v198_v28 = vrot.slane %v185_v21, 7  ;;  %v213_v29 = vrot.slane %v183_v20, 1  ;;  %vm702_vm4 = vmpackc.low %vm764_vm3, %vm737_vm2  ;;  %s181_s22 = scalar_lea.vmem %s898_s3, %s604_s11 }
  0x13   : > { %v722_v26 = vld [vmem:[%s896_s1 + $0x48] sm:$0xff]  ;;  %v214_v30 = vrot.slane %v184_v23, 1  ;;  %v212_v32 = vrot.slane %v182_v19, 1  ;;  %v197_v33 = vrot.slane %v184_v23, 7  ;;  %v713_v34 = vld [vmem:[%s896_s1] sm:$0xff]  ;;  %v226_v44 = vpack.c.bf16 %v183_v20, %v182_v19 }
  0x14   : > { %425 = vmatpush.bf16.msra.mxu0 %v718_v6  ;;  %741 = vmatpush.bf16.msra.mxu3 %v718_v6  ;;  %v730_v31 = vld [vmem:[%s896_s1 + $0x88] sm:$0xff]  ;;  %v721_v35 = vld [vmem:[%s896_s1 + $0x40] sm:$0xff]  ;;  %v202_v36 = vsel %vm199_vm0, %v195_v24, %v196_v27  ;;  %v203_v37 = vsel %vm199_vm0, %v198_v28, %v195_v24  ;;  %v215_v47 = vrot.slane %v185_v21, 1  ;;  %vm738_vm5 = vcmp.ne.s32.totalorder %v190_v48, 31 }
  0x15   : > { %444 = vmatpush.bf16.msra.mxu1 %v726_v7  ;;  %v218_v38 = vsel %vm216_vm1, %v213_v29, %v214_v30  ;;  %v729_v39 = vld [vmem:[%s896_s1 + $0x80] sm:$0xff]  ;;  %v219_v40 = vsel %vm216_vm1, %v212_v32, %v213_v29  ;;  %v200_v41 = vsel %vm199_vm0, %v197_v33, %v198_v28  ;;  %v201_v42 = vsel %vm199_vm0, %v196_v27, %v197_v33  ;;  %vm706_vm6 = vmpackc.low %vm738_vm5, %vm764_vm3 }
  0x16   : > { %463 = vmatpush.bf16.msra.mxu2 %v734_v8  ;;  %v703_v43 = vpack.c.bf16 %v202_v36, %v203_v37  ;;  %v227_v45 = vpack.c.bf16 %v218_v38, %v219_v40  ;;  %v228_v46 = vpack.c.bf16 %v200_v41, %v201_v42  ;;  %v217_v49 = vsel %vm216_vm1, %v214_v30, %v215_v47 }
  0x17   : > { %v220_v50 = vsel %vm216_vm1, %v215_v47, %v212_v32  ;;  %v229_v51 = vpack.c.bf16 %v185_v21, %v184_v23 }
  0x18   : > { %426 = vmatpush.bf16.msra.mxu0 %v717_v9  ;;  %742 = vmatpush.bf16.msra.mxu3 %v717_v9  ;;  %v707_v52 = vpack.c.bf16 %v220_v50, %v217_v49 }
  0x19   : > { %445 = vmatpush.bf16.msra.mxu1 %v725_v10 }
  0x1a   : > { %464 = vmatpush.bf16.msra.mxu2 %v733_v11 }
  0x1c   : > { %427 = vmatpush.bf16.msra.mxu0 %v716_v12  ;;  %743 = vmatpush.bf16.msra.mxu3 %v716_v12 }
  0x1d   : > { %446 = vmatpush.bf16.msra.mxu1 %v724_v13 }
  0x1e   : > { %465 = vmatpush.bf16.msra.mxu2 %v732_v14 }
  0x20   : > { %428 = vmatpush.bf16.msra.mxu0 %v715_v16  ;;  %744 = vmatpush.bf16.msra.mxu3 %v715_v16 }
  0x21   : > { %447 = vmatpush.bf16.msra.mxu1 %v723_v17 }
  0x22   : > { %466 = vmatpush.bf16.msra.mxu2 %v731_v18 }
  0x24   : > { %429 = vmatpush.bf16.msra.mxu0 %v714_v25  ;;  %745 = vmatpush.bf16.msra.mxu3 %v714_v25 }
  0x25   : > { %448 = vmatpush.bf16.msra.mxu1 %v722_v26 }
  0x26   : > { %467 = vmatpush.bf16.msra.mxu2 %v730_v31 }
  0x28   : > { %430 = vmatpush.bf16.msra.mxu0 %v713_v34  ;;  %746 = vmatpush.bf16.msra.mxu3 %v713_v34 }
  0x29   : > { %449 = vmatpush.bf16.msra.mxu1 %v721_v35 }
  0x2a   : > { %468 = vmatpush.bf16.msra.mxu2 %v729_v39 }
  0x2b   : > { %704 = vmatmul.msk.bf16.vlgmr.msra.gmra.mxu0 %vm702_vm4, %v703_v43  ;;  %436 = vmatmul.bf16.vlgmr.msra.gmra.mxu3 %v228_v46 }
  0x2c   : > { %450 = vmatmul.bf16.vlgmr.msra.gmra.mxu1 %v226_v44 }
  0x2d   : > { %469 = vmatmul.bf16.vlgmr.msra.gmra.mxu2 %v227_v45 }
  0x3c   : > { %455 = vmatmul.bf16.gmra.mxu1 %v229_v51 }
  0x3d   : > { %708 = vmatmul.msk.bf16.gmra.mxu2 %vm706_vm6, %v707_v52 }
  0xa8   : > { %v432_v54 = vpop.f32.mrf.mxu0 }
  0xa9   : > { %v451_v53 = vpop.f32.mrf.mxu1 }
  0xaa   : > { %v452_v55 = vadd.f32 %v451_v53, %v432_v54 }
  0xae   : > { %v437_v0 = vpop.f32.mrf.mxu3 }
  0xb0   : > { %v470_v56 = vpop.f32.mrf.mxu2  ;;  %v434_v59 = vpop.f32.mrf.mxu0 }
  0xb1   : > { %v471_v57 = vadd.f32 %v470_v56, %v452_v55  ;;  %v453_v58 = vpop.f32.mrf.mxu1 }
  0xb2   : > { %v454_v60 = vadd.f32 %v453_v58, %v434_v59 }
  0xb3   : > { %480 = vst [vmem:[%s177_s19] sm:$0xff] %v471_v57  ;;  %v493_v7 = vmul.f32 %v471_v57, %v471_v57 }
  0xb6   : > { %v439_v6 = vpop.f32.mrf.mxu3 }
  0xb8   : > { %v472_v61 = vpop.f32.mrf.mxu2 }
  0xb9   : > { %v473_v62 = vadd.f32 %v472_v61, %v454_v60  ;;  %v456_v63 = vpop.f32.mrf.mxu1 }
  0xba   : > { %v457_v1 = vadd.f32 %v456_v63, %v437_v0 }
  0xbb   : > { %481 = vst [vmem:[%s177_s19 + $0x8] sm:$0xff] %v473_v62  ;;  %v494_v5 = vmul.f32 %v473_v62, %v473_v62  ;;  %v484_v8 = vadd.f32 %v473_v62, %v471_v57 }
  0xbd   : > { %v497_v12 = vadd.f32 %v494_v5, %v493_v7 }
  0xc0   : > { %v475_v2 = vpop.f32.mrf.mxu2 }
  0xc1   : > { %v476_v3 = vadd.f32 %v475_v2, %v457_v1  ;;  %v458_v4 = vpop.f32.mrf.mxu1 }
  0xc2   : > { %v459_v10 = vadd.f32 %v458_v4, %v439_v6 }
  0xc3   : > { %482 = vst [vmem:[%s177_s19 + $0x10] sm:$0xff] %v476_v3  ;;  %v495_v9 = vmul.f32 %v476_v3, %v476_v3  ;;  %v485_v13 = vadd.f32 %v484_v8, %v476_v3 }
  0xc5   : > { %v498_v15 = vadd.f32 %v497_v12, %v495_v9 }
  0xc8   : > { %v477_v11 = vpop.f32.mrf.mxu2 }
  0xc9   : > { %v478_v14 = vadd.f32 %v477_v11, %v459_v10 }
  0xcb   : > { %483 = vst [vmem:[%s177_s19 + $0x18] sm:$0xff] %v478_v14  ;;  %v486_v16 = vadd.f32 %v485_v13, %v478_v14  ;;  %v496_v17 = vmul.f32 %v478_v14, %v478_v14 }
  0xcd   : > { %v487_v18 = vrot.slane %v486_v16, 4  ;;  %v499_v19 = vadd.f32 %v498_v15, %v496_v17 }
  0xcf   : > { %v488_v20 = vadd.f32 %v487_v18, %v486_v16  ;;  %v500_v21 = vrot.slane %v499_v19, 4 }
  0xd1   : > { %v489_v22 = vrot.slane %v488_v20, 2  ;;  %v501_v23 = vadd.f32 %v500_v21, %v499_v19 }
  0xd3   : > { %v490_v24 = vadd.f32 %v489_v22, %v488_v20  ;;  %v502_v25 = vrot.slane %v501_v23, 2 }
  0xd5   : > { %v491_v26 = vrot.slane %v490_v24, 1  ;;  %v503_v27 = vadd.f32 %v502_v25, %v501_v23 }
  0xd7   : > { %v504_v28 = vrot.slane %v503_v27, 1  ;;  %v492_v29 = vadd.f32 %v491_v26, %v490_v24 }
  0xd9   : > { %v505_v30 = vadd.f32 %v504_v28, %v503_v27 }
  0xdb   : > { %v507_v31 = vsel %vm506_vm7, %v492_v29, %v505_v30 }
  0xdc   : > { %508 = vst [vmem:[%s181_s22] sm:$0x3] %v507_v31 }
  0xdd PF: > { %s14_s12 = sadd.s32 1, %s762_s12  }
  0xde   : > { %p11_p4 = scmp.ge.s32.totalorder %s14_s12, 6  }
  0xe0   :  { %13 = sbr.rel (!%p11_p4) target bundleno = 1 (0x1), region = 70 }

// kernel: basic_block_forward.4
= control target key start
LH: loop header
LB: loop body
LE: loop exit
PB: predicated region body
PF: predicated region fallthrough
CT: control target
= control target key end

     0   :  { %s871_s18 = smov 0   ;;  %s987_s0 = inlined_call_operand.vmem [shape: f32[4,32,128], index: 0, kind: input, shape index: {}]   ;;  %s988_s1 = inlined_call_operand.vmem [shape: f32[1,128], index: 1, kind: input, shape index: {}]   ;;  %s989_s2 = inlined_call_operand.vmem [shape: f32[1,128], index: 2, kind: input, shape index: {}]   ;;  %s990_s3 = inlined_call_operand.vmem [shape: bf16[384,128], index: 3, kind: input, shape index: {}]   ;;  %s991_s4 = inlined_call_operand.vmem [shape: f32[4,32,128], index: 4, kind: output, shape index: {0}]   ;;  %s992_s5 = inlined_call_operand.vmem [shape: f32[4,2,128], index: 5, kind: output, shape index: {1}]  }
   0x1 LB: > { %s669_s19 = sadd.s32 4294967295, %s838_s18   ;;  %p673_p0 = scmp.ge.s32.totalorder %s838_s18, 1  ;;  %s838_s18 = sphi %s871_s18, %s16_s18  }
   0x2   : > { %p190_p1 = scmp.lt.s32.totalorder %s838_s18, 5 }
   0x4   : > { %p191_p2 = pnand %p673_p0, %p190_p1 }
   0x5   : > { %p222_p3 = scmp.lt.s32.totalorder (!%p191_p2), %s669_s19, 3 }
   0x6   : > { %194 = sbr.rel (%p191_p2) target bundleno = 221 (0xdd), region = 36 }
   0xb   : > { %v794_v0 = vld [vmem:[%s990_s3 + $0x38] sm:$0xff]  ;;  %v793_v3 = vld [vmem:[%s990_s3 + $0x30] sm:$0xff]  ;;  %s994_s19 = smov (!%p222_p3, %s669_s19), 3  ;;  %v792_v6 = vld [vmem:[%s990_s3 + $0x28] sm:$0xff]  ;;  %v260_v29 = vlaneseq  ;;  %vm840_vm3 = vmmov 1   ;;  %vm580_vm7 = vcmask 1040384  }
   0xc   : > { %v802_v1 = vld [vmem:[%s990_s3 + $0x78] sm:$0xff]  ;;  %497 = vmatpush.bf16.msra.mxu0 %v794_v0  ;;  %v801_v4 = vld [vmem:[%s990_s3 + $0x70] sm:$0xff]  ;;  %813 = vmatpush.bf16.msra.mxu3 %v794_v0  ;;  %s785_s7 = sshll.u32 %s994_s19, 5  ;;  %v800_v7 = vld [vmem:[%s990_s3 + $0x68] sm:$0xff] }
   0xd   : > { %v810_v2 = vld [vmem:[%s990_s3 + $0xb8] sm:$0xff]  ;;  %516 = vmatpush.bf16.msra.mxu1 %v802_v1  ;;  %v809_v5 = vld [vmem:[%s990_s3 + $0xb0] sm:$0xff]  ;;  %s226_s10 = scalar_lea.vmem %s987_s0, %s785_s7  ;;  %v808_v8 = vld [vmem:[%s990_s3 + $0xa8] sm:$0xff]  ;;  %v261_v37 = vshrl.u32 %v260_v29, 7  ;;  %s231_s9 = scalar_lea.vmem %s991_s4, %s785_s7 }
   0xe   : > { %535 = vmatpush.bf16.msra.mxu2 %v810_v2  ;;  %v791_v9 = vld [vmem:[%s990_s3 + $0x20] sm:$0xff]  ;;  %v237_v11 = vld [vmem:[%s226_s10 + $0x8] sm:$0xff]  ;;  %v239_v12 = vld [vmem:[%s226_s10 + $0x18] sm:$0xff]  ;;  %s678_s7 = sshll.u32 %s994_s19, 1 }
   0xf   : > { %v236_v10 = vld [vmem:[%s226_s10] sm:$0xff]  ;;  %v238_v16 = vld [vmem:[%s226_s10 + $0x10] sm:$0xff]  ;;  %v790_v23 = vld [vmem:[%s990_s3 + $0x18] sm:$0xff]  ;;  %vm273_vm0 = vcmp.lt.s32.totalorder %v261_v37, 1  ;;  %vm290_vm1 = vcmp.lt.s32.totalorder %v261_v37, 7  ;;  %vm811_vm2 = vcmp.ne.s32.totalorder %v261_v37, 0  ;;  %s235_s12 = scalar_lea.vmem %s992_s5, %s678_s7 }
  0x10   : > { %498 = vmatpush.bf16.msra.mxu0 %v793_v3  ;;  %814 = vmatpush.bf16.msra.mxu3 %v793_v3  ;;  %v830_v13 = vld [vmem:[%s988_s1] ss:$0 sm:$0xff]  ;;  %v798_v24 = vld [vmem:[%s990_s3 + $0x58] sm:$0xff]  ;;  %v789_v31 = vld [vmem:[%s990_s3 + $0x10] sm:$0xff]  ;;  %v264_v62 = vadd.s32 24, %v261_v37 }
  0x11   : > { %517 = vmatpush.bf16.msra.mxu1 %v801_v4  ;;  %v799_v14 = vld [vmem:[%s990_s3 + $0x60] sm:$0xff]  ;;  %v244_v18 = vmul.f32 %v830_v13, %v236_v10  ;;  %v245_v19 = vmul.f32 %v830_v13, %v237_v11  ;;  %v247_v20 = vmul.f32 %v830_v13, %v239_v12  ;;  %v246_v21 = vmul.f32 %v830_v13, %v238_v16  ;;  %v806_v28 = vld [vmem:[%s990_s3 + $0x98] sm:$0xff]  ;;  %v797_v32 = vld [vmem:[%s990_s3 + $0x50] sm:$0xff] }
  0x12   : > { %536 = vmatpush.bf16.msra.mxu2 %v809_v5  ;;  %v831_v15 = vld [vmem:[%s989_s2] ss:$0 sm:$0xff]  ;;  %v805_v36 = vld [vmem:[%s990_s3 + $0x90] sm:$0xff]  ;;  %v788_v39 = vld [vmem:[%s990_s3 + $0x8] sm:$0xff]  ;;  %vm812_vm5 = vcmp.ne.s32.totalorder %v264_v62, 31 }
  0x13   : > { %v807_v17 = vld [vmem:[%s990_s3 + $0xa0] sm:$0xff]  ;;  %v252_v22 = vadd.f32 %v831_v15, %v244_v18  ;;  %v253_v25 = vadd.f32 %v831_v15, %v245_v19  ;;  %v255_v26 = vadd.f32 %v831_v15, %v247_v20  ;;  %v254_v27 = vadd.f32 %v831_v15, %v246_v21  ;;  %v796_v40 = vld [vmem:[%s990_s3 + $0x48] sm:$0xff]  ;;  %vm776_vm4 = vmpackc.low %vm840_vm3, %vm811_vm2 }
  0x14   : > { %499 = vmatpush.bf16.msra.mxu0 %v792_v6  ;;  %815 = vmatpush.bf16.msra.mxu3 %v792_v6  ;;  %v804_v45 = vld [vmem:[%s990_s3 + $0x88] sm:$0xff]  ;;  %v787_v48 = vld [vmem:[%s990_s3] sm:$0xff]  ;;  %vm780_vm6 = vmpackc.low %vm812_vm5, %vm840_vm3 }
  0x15   : > { %518 = vmatpush.bf16.msra.mxu1 %v800_v7  ;;  %v256_v30 = vmax.f32 %v252_v22, 0.0  ;;  %v257_v33 = vmax.f32 %v253_v25, 0.0  ;;  %v259_v34 = vmax.f32 %v255_v26, 0.0  ;;  %v258_v35 = vmax.f32 %v254_v27, 0.0  ;;  %v795_v49 = vld [vmem:[%s990_s3 + $0x40] sm:$0xff] }
  0x16   : > { %537 = vmatpush.bf16.msra.mxu2 %v808_v8  ;;  %v803_v53 = vld [vmem:[%s990_s3 + $0x80] sm:$0xff] }
  0x17   : > { %v269_v38 = vrot.slane %v256_v30, 7  ;;  %v270_v41 = vrot.slane %v257_v33, 7  ;;  %v272_v42 = vrot.slane %v259_v34, 7  ;;  %v287_v43 = vrot.slane %v257_v33, 1 }
  0x18   : > { %500 = vmatpush.bf16.msra.mxu0 %v791_v9  ;;  %816 = vmatpush.bf16.msra.mxu3 %v791_v9  ;;  %v288_v44 = vrot.slane %v258_v35, 1  ;;  %v286_v46 = vrot.slane %v256_v30, 1  ;;  %v271_v47 = vrot.slane %v258_v35, 7  ;;  %v300_v58 = vpack.c.bf16 %v257_v33, %v256_v30 }
  0x19   : > { %519 = vmatpush.bf16.msra.mxu1 %v799_v14  ;;  %v276_v50 = vsel %vm273_vm0, %v269_v38, %v270_v41  ;;  %v277_v51 = vsel %vm273_vm0, %v272_v42, %v269_v38  ;;  %v289_v61 = vrot.slane %v259_v34, 1  ;;  %v303_v1 = vpack.c.bf16 %v259_v34, %v258_v35 }
  0x1a   : > { %538 = vmatpush.bf16.msra.mxu2 %v807_v17  ;;  %v292_v52 = vsel %vm290_vm1, %v287_v43, %v288_v44  ;;  %v293_v54 = vsel %vm290_vm1, %v286_v46, %v287_v43  ;;  %v274_v55 = vsel %vm273_vm0, %v271_v47, %v272_v42  ;;  %v275_v56 = vsel %vm273_vm0, %v270_v41, %v271_v47 }
  0x1b   : > { %v777_v57 = vpack.c.bf16 %v276_v50, %v277_v51  ;;  %v301_v59 = vpack.c.bf16 %v292_v52, %v293_v54  ;;  %v302_v60 = vpack.c.bf16 %v274_v55, %v275_v56  ;;  %v291_v63 = vsel %vm290_vm1, %v288_v44, %v289_v61 }
  0x1c   : > { %501 = vmatpush.bf16.msra.mxu0 %v790_v23  ;;  %817 = vmatpush.bf16.msra.mxu3 %v790_v23  ;;  %v294_v0 = vsel %vm290_vm1, %v289_v61, %v286_v46 }
  0x1d   : > { %520 = vmatpush.bf16.msra.mxu1 %v798_v24  ;;  %v781_v2 = vpack.c.bf16 %v294_v0, %v291_v63 }
  0x1e   : > { %539 = vmatpush.bf16.msra.mxu2 %v806_v28 }
  0x20   : > { %502 = vmatpush.bf16.msra.mxu0 %v789_v31  ;;  %818 = vmatpush.bf16.msra.mxu3 %v789_v31 }
  0x21   : > { %521 = vmatpush.bf16.msra.mxu1 %v797_v32 }
  0x22   : > { %540 = vmatpush.bf16.msra.mxu2 %v805_v36 }
  0x24   : > { %503 = vmatpush.bf16.msra.mxu0 %v788_v39  ;;  %819 = vmatpush.bf16.msra.mxu3 %v788_v39 }
  0x25   : > { %522 = vmatpush.bf16.msra.mxu1 %v796_v40 }
  0x26   : > { %541 = vmatpush.bf16.msra.mxu2 %v804_v45 }
  0x28   : > { %504 = vmatpush.bf16.msra.mxu0 %v787_v48  ;;  %820 = vmatpush.bf16.msra.mxu3 %v787_v48 }
  0x29   : > { %523 = vmatpush.bf16.msra.mxu1 %v795_v49 }
  0x2a   : > { %542 = vmatpush.bf16.msra.mxu2 %v803_v53 }
  0x2b   : > { %778 = vmatmul.msk.bf16.vlgmr.msra.gmra.mxu0 %vm776_vm4, %v777_v57  ;;  %510 = vmatmul.bf16.vlgmr.msra.gmra.mxu3 %v302_v60 }
  0x2c   : > { %524 = vmatmul.bf16.vlgmr.msra.gmra.mxu1 %v300_v58 }
  0x2d   : > { %543 = vmatmul.bf16.vlgmr.msra.gmra.mxu2 %v301_v59 }
  0x3c   : > { %529 = vmatmul.bf16.gmra.mxu1 %v303_v1 }
  0x3d   : > { %782 = vmatmul.msk.bf16.gmra.mxu2 %vm780_vm6, %v781_v2 }
  0xa8   : > { %v506_v4 = vpop.f32.mrf.mxu0 }
  0xa9   : > { %v525_v3 = vpop.f32.mrf.mxu1 }
  0xaa   : > { %v526_v5 = vadd.f32 %v525_v3, %v506_v4 }
  0xae   : > { %v511_v14 = vpop.f32.mrf.mxu3 }
  0xb0   : > { %v544_v6 = vpop.f32.mrf.mxu2  ;;  %v508_v9 = vpop.f32.mrf.mxu0 }
  0xb1   : > { %v545_v7 = vadd.f32 %v544_v6, %v526_v5  ;;  %v527_v8 = vpop.f32.mrf.mxu1 }
  0xb2   : > { %v528_v10 = vadd.f32 %v527_v8, %v508_v9 }
  0xb3   : > { %554 = vst [vmem:[%s231_s9] sm:$0xff] %v545_v7  ;;  %v567_v21 = vmul.f32 %v545_v7, %v545_v7 }
  0xb6   : > { %v513_v20 = vpop.f32.mrf.mxu3 }
  0xb8   : > { %v546_v11 = vpop.f32.mrf.mxu2 }
  0xb9   : > { %v547_v12 = vadd.f32 %v546_v11, %v528_v10  ;;  %v530_v13 = vpop.f32.mrf.mxu1 }
  0xba   : > { %v531_v15 = vadd.f32 %v530_v13, %v511_v14 }
  0xbb   : > { %555 = vst [vmem:[%s231_s9 + $0x8] sm:$0xff] %v547_v12  ;;  %v568_v19 = vmul.f32 %v547_v12, %v547_v12  ;;  %v558_v22 = vadd.f32 %v547_v12, %v545_v7 }
  0xbd   : > { %v571_v26 = vadd.f32 %v568_v19, %v567_v21 }
  0xc0   : > { %v549_v16 = vpop.f32.mrf.mxu2 }
  0xc1   : > { %v550_v17 = vadd.f32 %v549_v16, %v531_v15  ;;  %v532_v18 = vpop.f32.mrf.mxu1 }
  0xc2   : > { %v533_v24 = vadd.f32 %v532_v18, %v513_v20 }
  0xc3   : > { %556 = vst [vmem:[%s231_s9 + $0x10] sm:$0xff] %v550_v17  ;;  %v569_v23 = vmul.f32 %v550_v17, %v550_v17  ;;  %v559_v27 = vadd.f32 %v558_v22, %v550_v17 }
  0xc5   : > { %v572_v29 = vadd.f32 %v571_v26, %v569_v23 }
  0xc8   : > { %v551_v25 = vpop.f32.mrf.mxu2 }
  0xc9   : > { %v552_v28 = vadd.f32 %v551_v25, %v533_v24 }
  0xcb   : > { %557 = vst [vmem:[%s231_s9 + $0x18] sm:$0xff] %v552_v28  ;;  %v560_v30 = vadd.f32 %v559_v27, %v552_v28  ;;  %v570_v31 = vmul.f32 %v552_v28, %v552_v28 }
  0xcd   : > { %v561_v32 = vrot.slane %v560_v30, 4  ;;  %v573_v33 = vadd.f32 %v572_v29, %v570_v31 }
  0xcf   : > { %v562_v34 = vadd.f32 %v561_v32, %v560_v30  ;;  %v574_v35 = vrot.slane %v573_v33, 4 }
  0xd1   : > { %v563_v36 = vrot.slane %v562_v34, 2  ;;  %v575_v37 = vadd.f32 %v574_v35, %v573_v33 }
  0xd3   : > { %v564_v38 = vadd.f32 %v563_v36, %v562_v34  ;;  %v576_v39 = vrot.slane %v575_v37, 2 }
  0xd5   : > { %v565_v40 = vrot.slane %v564_v38, 1  ;;  %v577_v41 = vadd.f32 %v576_v39, %v575_v37 }
  0xd7   : > { %v578_v42 = vrot.slane %v577_v41, 1  ;;  %v566_v43 = vadd.f32 %v565_v40, %v564_v38 }
  0xd9   : > { %v579_v44 = vadd.f32 %v578_v42, %v577_v41 }
  0xdb   : > { %v581_v45 = vsel %vm580_vm7, %v566_v43, %v579_v44 }
  0xdc   : > { %582 = vst [vmem:[%s235_s12] sm:$0x3] %v581_v45 }
  0xdd PF: > { %s16_s18 = sadd.s32 1, %s838_s18  }
  0xde   : > { %p13_p4 = scmp.ge.s32.totalorder %s16_s18, 6  }
  0xe0   :  { %15 = sbr.rel (!%p13_p4) target bundleno = 1 (0x1), region = 78 }

</bundles_post_ra>
